<compile_context>
chip_gen: v7x
topology: tpu7x:2x2x1
jax: 0.10.0
libtpu: 0.0.40
codegen_flags: <defaults>
</compile_context>

<pallas_src>
import jax
import jax.numpy as jnp
from jax.experimental import pallas as pl
from jax.experimental.pallas import tpu as pltpu

_LANE = 128          # TPU lane width; class dim is padded to this
_H2P = 128           # hidden2 (64) padded to a full lane row / MXU tile
_PAD_BIAS = -1e30    # bias of padded (fake) classes -> exp() == 0 in logsumexp


def mlp_kernel(x_ref, w1_ref, b1_ref, w2_ref, b2_ref, w3_ref, b3_ref, o_ref):
    # x arrives f32 straight from HBM; cast to bf16 here (free VPU work hidden under
    # the MXU/DMA). Dots accumulate in f32; all elementwise math stays f32 (v5e has
    # no bf16 VPU/EUP path).
    x = x_ref[...].astype(jnp.bfloat16)                                   # [TB, 784]

    h1 = jnp.dot(x, w1_ref[...], preferred_element_type=jnp.float32)      # [TB, 256]
    h1 = jnp.maximum(h1 + b1_ref[...], 0.0)

    h2 = jnp.dot(h1.astype(jnp.bfloat16), w2_ref[...],
                 preferred_element_type=jnp.float32)                      # [TB, 128]
    h2 = jnp.maximum(h2 + b2_ref[...], 0.0)

    logits = jnp.dot(h2.astype(jnp.bfloat16), w3_ref[...],
                     preferred_element_type=jnp.float32) + b3_ref[...]    # [TB, 128]

    # Numerically-stable log_softmax over the (padded) class dim. Padded classes carry
    # bias -1e30, so they never win the max and contribute exactly 0 to the sum.
    m = jnp.max(logits, axis=-1, keepdims=True)
    shifted = logits - m
    lse = jnp.log(jnp.sum(jnp.exp(shifted), axis=-1, keepdims=True))
    o_ref[...] = shifted - lse


def prepare_params(params, num_classes):
    """One-time weight prep (call once, outside the per-step forward path).

    Returns (w1 bf16 [784,256], b1 f32 [1,256], w2 bf16 [256,128], b2 f32 [1,128],
             w3 bf16 [128,128], b3 f32 [1,128]) with hidden2 and class dims padded.
    """
    w1, b1, w2, b2, w3, b3 = params
    input_size, h1 = w1.shape
    h2 = w2.shape[1]
    assert w3.shape[0] == h2 and w3.shape[1] == num_classes and num_classes <= _LANE
    assert h2 <= _H2P

    # Pad hidden2 64 -> 128: zero w2 cols + zero b2 entries => ReLU keeps them at 0,
    # and zero w3 rows => no contribution to logits. Result is bit-identical.
    w2p = jnp.zeros((h1, _H2P), w2.dtype).at[:, :h2].set(w2)
    b2p = jnp.zeros((_H2P,), jnp.float32).at[:h2].set(b2.astype(jnp.float32))

    # Pad classes to a full 128-lane column (lane-dense unmasked stores, full MXU N).
    w3p = jnp.zeros((_H2P, _LANE), w3.dtype).at[:h2, :num_classes].set(w3)
    b3p = jnp.full((_LANE,), _PAD_BIAS, jnp.float32).at[:num_classes].set(
        b3.astype(jnp.float32))

    return (
        w1.astype(jnp.bfloat16),
        b1.astype(jnp.float32).reshape(1, h1),
        w2p.astype(jnp.bfloat16),
        b2p.reshape(1, _H2P),
        w3p.astype(jnp.bfloat16),
        b3p.reshape(1, _LANE),
    )


def _pick_tile(B, tile_b):
    """Batch tile: multiple of 8 (f32 sublanes), >=2 grid steps when B allows so both
    v7x TensorCores get work, and 256-1024 at large B for the HBM roofline."""
    if tile_b is not None:
        tb = min(tile_b, B)
    elif B >= 1024:
        tb = max(min(pl.cdiv(B, 4), 1024), 256)   # >=4 steps, big tiles
    else:
        tb = pl.cdiv(B, 2)                        # >=2 steps (v7x megacore)
    if tb >= B or B <= 8:
        return B                                  # full-array block is always legal
    return max(8, (tb // 8) * 8)


def mnist_classifier_forward(x_nchw, prepped, num_classes, *, tile_b=None):
    """x_nchw: [B, 1, 28, 28] float32 -> [B, num_classes] log-probabilities."""
    w1, b1, w2, b2, w3, b3 = prepped
    input_size, h1 = w1.shape
    h2p = w2.shape[1]
    B = x_nchw.shape[0]

    # Flatten exactly like torch.flatten(x, start_dim=1); keep f32 (cast is in-kernel).
    x = x_nchw.reshape(B, -1).astype(jnp.float32)
    assert x.shape[1] == input_size

    tb = _pick_tile(B, tile_b)

    # Tight, v7x-safe VMEM budget from the actual per-step footprint (+slack).
    est = (2 * tb * input_size * 4                              # x tile, f32, 2 bufs
           + 2 * tb * _LANE * 4                                 # out tile, f32, 2 bufs
           + 2 * 2 * (input_size * h1 + h1 * h2p + h2p * _LANE)  # weights bf16 (worst)
           + 2 * 4 * (h1 + h2p + _LANE))                        # biases f32 (worst)
    vmem_limit = int(min(max(est + (4 << 20), 16 << 20), 32 << 20))

    out = pl.pallas_call(
        mlp_kernel,
        out_shape=jax.ShapeDtypeStruct((B, _LANE), jnp.float32),
        grid_spec=pltpu.PrefetchScalarGridSpec(
            num_scalar_prefetch=0,
            grid=(pl.cdiv(B, tb),),
            in_specs=[
                pl.BlockSpec((tb, input_size), lambda i: (i, 0)),  # x tile (f32)
                pl.BlockSpec((input_size, h1), lambda i: (0, 0)),  # w1 (bf16, resident)
                pl.BlockSpec((1, h1), lambda i: (0, 0)),           # b1 (f32)
                pl.BlockSpec((h1, h2p), lambda i: (0, 0)),         # w2 padded (bf16)
                pl.BlockSpec((1, h2p), lambda i: (0, 0)),          # b2 padded (f32)
                pl.BlockSpec((h2p, _LANE), lambda i: (0, 0)),      # w3 padded (bf16)
                pl.BlockSpec((1, _LANE), lambda i: (0, 0)),        # b3 padded (f32)
            ],
            out_specs=pl.BlockSpec((tb, _LANE), lambda i: (i, 0)),
        ),
        compiler_params=pltpu.CompilerParams(
            dimension_semantics=("parallel",),
            vmem_limit_bytes=vmem_limit,
        ),
    )(x, w1, b1, w2, b2, w3, b3)

    # TODO(synk): fuse this slice into the downstream consumer (e.g. NLL kernel) to
    # avoid one extra XLA pass over the [B,128] slab.
    return out[:, :num_classes]


def init_params(key, input_size, num_classes):
    """Deterministic init mimicking nn.Linear's U(-1/sqrt(fan_in), 1/sqrt(fan_in))."""
    def linear(k, fan_in, fan_out):
        kw, kb = jax.random.split(k)
        bound = 1.0 / jnp.sqrt(fan_in)
        w = jax.random.uniform(kw, (fan_in, fan_out), jnp.float32, -bound, bound)
        b = jax.random.uniform(kb, (fan_out,), jnp.float32, -bound, bound)
        return w, b

    k1, k2, k3 = jax.random.split(key, 3)
    w1, b1 = linear(k1, input_size, 256)
    w2, b2 = linear(k2, 256, 64)
    w3, b3 = linear(k3, 64, num_classes)
    return (w1, b1, w2, b2, w3, b3)


if __name__ == "__main__":
    key = jax.random.PRNGKey(0)
    k_x, k_p = jax.random.split(key)

    B, C, H, W = 32, 1, 28, 28          # MNIST-shaped input
    input_size = C * H * W              # 784
    num_classes = 10

    x = jax.random.normal(k_x, (B, C, H, W), dtype=jnp.float32)
    params = init_params(k_p, input_size, num_classes)

    # One-time weight prep (hoisted out of the forward path).
    prepped = prepare_params(params, num_classes)

    # Default tiling at B=32 -> tb=16, a 2-step pipelined grid (both v7x TCs used).
    out = mnist_classifier_forward(x, prepped, num_classes)
    out = jax.block_until_ready(out)
    assert out.shape == (B, num_classes)

    # Reference 1: same math with bf16-rounded matmul operands (tight tolerance).
    w1, b1, w2, b2, w3, b3 = params
    xr = x.reshape(B, -1)
    hb = jnp.maximum(jnp.dot(xr.astype(jnp.bfloat16), w1.astype(jnp.bfloat16),
                             preferred_element_type=jnp.float32) + b1, 0.0)
    hb = jnp.maximum(jnp.dot(hb.astype(jnp.bfloat16), w2.astype(jnp.bfloat16),
                             preferred_element_type=jnp.float32) + b2, 0.0)
    logits_b = jnp.dot(hb.astype(jnp.bfloat16), w3.astype(jnp.bfloat16),
                       preferred_element_type=jnp.float32) + b3
    ref_bf16 = jax.nn.log_softmax(logits_b, axis=1)
    assert jnp.allclose(out, ref_bf16, atol=2e-3, rtol=2e-3)

    # Reference 2: full-f32 module semantics (looser tolerance due to bf16 operands).
    hf = jnp.maximum(xr @ w1 + b1, 0.0)
    hf = jnp.maximum(hf @ w2 + b2, 0.0)
    ref_f32 = jax.nn.log_softmax(hf @ w3 + b3, axis=1)
    assert jnp.allclose(out, ref_f32, atol=3e-2, rtol=3e-2)

    print("KERNEL_OK")
</pallas_src>

<mosaic_0001>
module attributes {stable_mosaic.version = 11 : i64} {
  func.func @mlp_kernel(%arg0: i32, %arg1: memref<16x784xf32, #tpu.memory_space<vmem>>, %arg2: memref<784x256xbf16, #tpu.memory_space<vmem>>, %arg3: memref<1x256xf32, #tpu.memory_space<vmem>>, %arg4: memref<256x128xbf16, #tpu.memory_space<vmem>>, %arg5: memref<1x128xf32, #tpu.memory_space<vmem>>, %arg6: memref<128x128xbf16, #tpu.memory_space<vmem>>, %arg7: memref<1x128xf32, #tpu.memory_space<vmem>>, %arg8: memref<16x128xf32, #tpu.memory_space<vmem>>) attributes {dimension_semantics = [#tpu.dimension_semantics<parallel>], iteration_bounds = array<i64: 2>, scalar_prefetch = 0 : i64, scratch_operands = 0 : i64, tpu.core_type = #tpu.core_type<tc>, window_params = [{transform_indices = @transform_0, window_bounds = array<i64: 16, 784>}, {pipeline_mode = #tpu.pipeline_mode<synchronous>, transform_indices = @transform_1, window_bounds = array<i64: 784, 256>}, {pipeline_mode = #tpu.pipeline_mode<synchronous>, transform_indices = @transform_2, window_bounds = array<i64: 1, 256>}, {pipeline_mode = #tpu.pipeline_mode<synchronous>, transform_indices = @transform_3, window_bounds = array<i64: 256, 128>}, {pipeline_mode = #tpu.pipeline_mode<synchronous>, transform_indices = @transform_4, window_bounds = array<i64: 1, 128>}, {pipeline_mode = #tpu.pipeline_mode<synchronous>, transform_indices = @transform_5, window_bounds = array<i64: 128, 128>}, {pipeline_mode = #tpu.pipeline_mode<synchronous>, transform_indices = @transform_6, window_bounds = array<i64: 1, 128>}, {transform_indices = @transform_7, window_bounds = array<i64: 16, 128>}]} {
    %c0 = arith.constant 0 : index
    %c0_0 = arith.constant 0 : index
    %0 = vector.load %arg1[%c0, %c0_0] : memref<16x784xf32, #tpu.memory_space<vmem>>, vector<16x784xf32>
    %1 = arith.truncf %0 : vector<16x784xf32> to vector<16x784xbf16>
    %c0_1 = arith.constant 0 : index
    %c0_2 = arith.constant 0 : index
    %2 = vector.load %arg2[%c0_1, %c0_2] : memref<784x256xbf16, #tpu.memory_space<vmem>>, vector<784x256xbf16>
    %cst = arith.constant dense<0.000000e+00> : vector<16x256xf32>
    %3 = tpu.matmul %1, %2, %cst {dimension_numbers = #tpu.dot_dimension_numbers<[1], [0], [0], [1], [0, 0, 1, 1], [], []>} : vector<16x784xbf16>, vector<784x256xbf16>, vector<16x256xf32> -> vector<16x256xf32>
    %c0_3 = arith.constant 0 : index
    %c0_4 = arith.constant 0 : index
    %4 = vector.load %arg3[%c0_3, %c0_4] : memref<1x256xf32, #tpu.memory_space<vmem>>, vector<1x256xf32>
    %5 = vector.broadcast %4 : vector<1x256xf32> to vector<16x256xf32>
    %6 = arith.addf %3, %5 : vector<16x256xf32>
    %cst_5 = arith.constant 0.000000e+00 : f32
    %7 = vector.broadcast %cst_5 : f32 to vector<16x256xf32>
    %8 = arith.maximumf %6, %7 : vector<16x256xf32>
    %9 = arith.truncf %8 : vector<16x256xf32> to vector<16x256xbf16>
    %c0_6 = arith.constant 0 : index
    %c0_7 = arith.constant 0 : index
    %10 = vector.load %arg4[%c0_6, %c0_7] : memref<256x128xbf16, #tpu.memory_space<vmem>>, vector<256x128xbf16>
    %cst_8 = arith.constant dense<0.000000e+00> : vector<16x128xf32>
    %11 = tpu.matmul %9, %10, %cst_8 {dimension_numbers = #tpu.dot_dimension_numbers<[1], [0], [0], [1], [0, 0, 1, 1], [], []>} : vector<16x256xbf16>, vector<256x128xbf16>, vector<16x128xf32> -> vector<16x128xf32>
    %c0_9 = arith.constant 0 : index
    %c0_10 = arith.constant 0 : index
    %12 = vector.load %arg5[%c0_9, %c0_10] : memref<1x128xf32, #tpu.memory_space<vmem>>, vector<1x128xf32>
    %13 = vector.broadcast %12 : vector<1x128xf32> to vector<16x128xf32>
    %14 = arith.addf %11, %13 : vector<16x128xf32>
    %cst_11 = arith.constant 0.000000e+00 : f32
    %15 = vector.broadcast %cst_11 : f32 to vector<16x128xf32>
    %16 = arith.maximumf %14, %15 : vector<16x128xf32>
    %17 = arith.truncf %16 : vector<16x128xf32> to vector<16x128xbf16>
    %c0_12 = arith.constant 0 : index
    %c0_13 = arith.constant 0 : index
    %18 = vector.load %arg6[%c0_12, %c0_13] : memref<128x128xbf16, #tpu.memory_space<vmem>>, vector<128x128xbf16>
    %cst_14 = arith.constant dense<0.000000e+00> : vector<16x128xf32>
    %19 = tpu.matmul %17, %18, %cst_14 {dimension_numbers = #tpu.dot_dimension_numbers<[1], [0], [0], [1], [0, 0, 1, 1], [], []>} : vector<16x128xbf16>, vector<128x128xbf16>, vector<16x128xf32> -> vector<16x128xf32>
    %c0_15 = arith.constant 0 : index
    %c0_16 = arith.constant 0 : index
    %20 = vector.load %arg7[%c0_15, %c0_16] : memref<1x128xf32, #tpu.memory_space<vmem>>, vector<1x128xf32>
    %21 = vector.broadcast %20 : vector<1x128xf32> to vector<16x128xf32>
    %22 = arith.addf %19, %21 : vector<16x128xf32>
    %cst_17 = arith.constant dense<0xFF800000> : vector<16xf32>
    %23 = vector.multi_reduction <maximumf>, %22, %cst_17 [1] : vector<16x128xf32> to vector<16xf32>
    %24 = vector.shape_cast %23 : vector<16xf32> to vector<16x1xf32>
    %25 = vector.broadcast %24 : vector<16x1xf32> to vector<16x128xf32>
    %26 = arith.subf %22, %25 : vector<16x128xf32>
    %27 = math.exp %26 : vector<16x128xf32>
    %cst_18 = arith.constant dense<0.000000e+00> : vector<16xf32>
    %28 = vector.multi_reduction <add>, %27, %cst_18 [1] : vector<16x128xf32> to vector<16xf32>
    %29 = vector.shape_cast %28 : vector<16xf32> to vector<16x1xf32>
    %30 = math.log %29 : vector<16x1xf32>
    %31 = vector.broadcast %30 : vector<16x1xf32> to vector<16x128xf32>
    %32 = arith.subf %26, %31 : vector<16x128xf32>
    %c0_19 = arith.constant 0 : index
    %c0_20 = arith.constant 0 : index
    %33 = vector.load %arg8[%c0_19, %c0_20] : memref<16x128xf32, #tpu.memory_space<vmem>>, vector<16x128xf32>
    tpu.vector_store %arg8[%c0_19, %c0_20], %32 {strides = array<i32>} : memref<16x128xf32, #tpu.memory_space<vmem>>, vector<16x128xf32>,
    return
  }
  func.func @transform_0(%arg0: i32) -> (i32, i32) {
    %c0_i32 = arith.constant 0 : i32
    %c0_i32_0 = arith.constant 0 : i32
    return %arg0, %c0_i32 : i32, i32
  }
  func.func @transform_1(%arg0: i32) -> (i32, i32) {
    %c0_i32 = arith.constant 0 : i32
    %c0_i32_0 = arith.constant 0 : i32
    %c0_i32_1 = arith.constant 0 : i32
    return %c0_i32, %c0_i32_0 : i32, i32
  }
  func.func @transform_2(%arg0: i32) -> (i32, i32) {
    %c0_i32 = arith.constant 0 : i32
    %c0_i32_0 = arith.constant 0 : i32
    %c0_i32_1 = arith.constant 0 : i32
    return %c0_i32, %c0_i32_0 : i32, i32
  }
  func.func @transform_3(%arg0: i32) -> (i32, i32) {
    %c0_i32 = arith.constant 0 : i32
    %c0_i32_0 = arith.constant 0 : i32
    %c0_i32_1 = arith.constant 0 : i32
    return %c0_i32, %c0_i32_0 : i32, i32
  }
  func.func @transform_4(%arg0: i32) -> (i32, i32) {
    %c0_i32 = arith.constant 0 : i32
    %c0_i32_0 = arith.constant 0 : i32
    %c0_i32_1 = arith.constant 0 : i32
    return %c0_i32, %c0_i32_0 : i32, i32
  }
  func.func @transform_5(%arg0: i32) -> (i32, i32) {
    %c0_i32 = arith.constant 0 : i32
    %c0_i32_0 = arith.constant 0 : i32
    %c0_i32_1 = arith.constant 0 : i32
    return %c0_i32, %c0_i32_0 : i32, i32
  }
  func.func @transform_6(%arg0: i32) -> (i32, i32) {
    %c0_i32 = arith.constant 0 : i32
    %c0_i32_0 = arith.constant 0 : i32
    %c0_i32_1 = arith.constant 0 : i32
    return %c0_i32, %c0_i32_0 : i32, i32
  }
  func.func @transform_7(%arg0: i32) -> (i32, i32) {
    %c0_i32 = arith.constant 0 : i32
    %c0_i32_0 = arith.constant 0 : i32
    return %arg0, %c0_i32 : i32, i32
  }
}

</mosaic_0001>

<bundles_post_ra>
// kernel: tpu_custom_call.1
= control target key start
LH: loop header
LB: loop body
LE: loop exit
PB: predicated region body
PF: predicated region fallthrough
CT: control target
= control target key end

     0   :  { %s2587_s0 = inlined_call_operand.hbm [shape: f32[32,784], index: 0, kind: input, shape index: {}]   ;;  %s2588_s1 = inlined_call_operand.hbm [shape: bf16[784,256], index: 1, kind: input, shape index: {}]   ;;  %s2589_s2 = inlined_call_operand.vmem [shape: f32[1,256], index: 2, kind: input, shape index: {}]   ;;  %s2590_s3 = inlined_call_operand.hbm [shape: bf16[256,128], index: 3, kind: input, shape index: {}]   ;;  %s2591_s4 = inlined_call_operand.vmem [shape: f32[1,128], index: 4, kind: input, shape index: {}]   ;;  %s2592_s5 = inlined_call_operand.hbm [shape: bf16[128,128], index: 5, kind: input, shape index: {}]   ;;  %s2593_s6 = inlined_call_operand.vmem [shape: f32[1,128], index: 6, kind: input, shape index: {}]   ;;  %s2594_s7 = inlined_call_operand.hbm [shape: f32[32,128], index: 7, kind: output, shape index: {}]  }
   0x1   :  { %2599 = sst [smem:[#allocation16_spill]] %s2588_s1 }
   0x2   :  { %12 = vsyncpa [#allocation3], 0 }
   0x3   :  { %14 = vsyncpa [#allocation3 + $0x1], 0 }
   0x4   :  { %15 = vsyncpa [#allocation6], 0 }
   0x5   :  { %16 = vsyncpa [#allocation9], 0 }
   0x6   :  { %17 = vsyncpa [#allocation4], 0 }
   0x7   :  { %19 = vsyncpa [#allocation4 + $0x1], 0  ;;  %s2305_s24 = smov 0   ;;  %s2307_s25 = smov 0  }
   0x8   :  { %s2309_s26 = smov 0   ;;  %s2311_s27 = smov 0  }
   0x9 LB: > { %s2326_s28 = sadd.s32 4294967295, %s2247_s27   ;;  %s1577_s29 = sadd.s32 4294967294, %s2247_s27   ;;  %s2247_s27 = sphi %s2311_s27, %s2622_s27   ;;  %s2243_s26 = sphi %s2309_s26, %s2621_s26   ;;  %s2239_s25 = sphi %s2307_s25, %s2620_s25   ;;  %s2235_s24 = sphi %s2305_s24, %s2619_s24  }
   0xa   : > { %p45_p0 = scmp.ne.s32.totalorder %s2239_s25, %s2235_s24  ;;  %p2595_p1 = scmp.eq.s32.totalorder %s2326_s28, 0 }
   0xb   : > { %p201_p3 = scmp.eq.s32.totalorder %s1577_s29, 1  ;;  %p1578_p5 = scmp.ge.s32.totalorder %s2247_s27, 1 }
   0xc   : > { %p2335_p4 = por %p2595_p1, %p45_p0  ;;  %p208_p7 = scmp.lt.s32.totalorder %s2247_s27, 3 }
   0xd   : > { %p2340_p6 = por %p201_p3, %p45_p0  ;;  %s2249_s10 = smov [#allocation5]  }
   0xe   : > { %s2600_s30 = scalar_select %p2335_p4, 1, 0 }
   0xf   : > { %s2601_s8 = scalar_select %p2340_p6, 1, 0 }
  0x10   : > { %p2345_p8 = pnand %p1578_p5, %p208_p7  ;;  %s220_s11 = sshll.u32 %s2249_s10, 4  ;;  %s2349_s11 = int_to_ptr.vmem [resolvable:$true] %s220_s11 }
  0x11   : > { %2602 = sst [smem:[#allocation15_spill]] %s2601_s8  ;;  %s2250_s13 = smov [#allocation7]  }
  0x12   : > { %s2603_s9 = scalar_select %p2345_p8, 1, 0 }
  0x13   : > { %p1808_p9 = pneg %p2345_p8  ;;  %s236_s14 = sshll.u32 %s2250_s13, 4  ;;  %s2360_s14 = int_to_ptr.vmem [resolvable:$true] %s236_s14 }
  0x14   : > { %s2605_s1 = sld [smem:[#allocation16_spill]] }
  0x15   : > { %p2356_p11 = pnand %p1808_p9, %p2595_p1 }
  0x17   : > { %p2370_p13 = pneg %p2356_p11 }
  0x1a   : > { %s2059_s17 = scalar_lea.hbm %s2605_s1, 12544 }
  0x1b   : > { %p2060_p12 = scmp.ne.s32.totalorder %s2605_s1, %s2059_s17  ;;  %p2066_p5 = scmp.lt.u32.totalorder %s2059_s17, %s2605_s1 }
  0x1d   : > { %p2062_p0 = pnand %p2370_p13, %p2060_p12 }
  0x1f   : > { %p2063_p3 = pneg %p2062_p0 }
  0x21   : > { %p2068_p7 = pnand %p2066_p5, %p2063_p3 }
  0x23   : > { %2071 = shalt.err (!%p2068_p7)
}
  0x24   : > { %s2072_s23 = scalar_lea.vmem %s2349_s11, 12544  ;;  %p2080_p2 = scmp.lt.s32.totalorder %s2349_s11, %s2349_s11 }
  0x25   : > { %p2073_p9 = scmp.ne.s32.totalorder %s2349_s11, %s2072_s23  ;;  %p2081_p6 = scmp.lt.s32.totalorder %s2072_s23, %s2072_s23 }
  0x27   : > { %p2075_p10 = pnand %p2073_p9, %p2370_p13  ;;  %p2082_p12 = por %p2081_p6, %p2080_p2 }
  0x29   : > { %p2076_p1 = pneg %p2075_p10 }
  0x2b   : > { %p2083_p0 = pnand %p2082_p12, %p2076_p1 }
  0x2d   : > { %2086 = shalt.err (!%p2083_p0)
}
  0x2e   : > { %s2251_s29 = smov 128   ;;  %s2252_s10 = smov 8  }
  0x2f   : > { %1811 = dma.hbm_to_vmem [thread:$0]  (!%p2356_p11), %s2605_s1, 12544, %s2349_s11, [#allocation6], %s2251_s29, %s2251_s29, %s2252_s10  }
  0x30   : > { %s2087_s18 = scalar_lea.hbm %s2590_s3, 2048 }
  0x31   : > { %p2088_p2 = scmp.ne.s32.totalorder %s2590_s3, %s2087_s18  ;;  %p2094_p10 = scmp.lt.u32.totalorder %s2087_s18, %s2590_s3 }
  0x33   : > { %p2090_p1 = pnand %p2088_p2, %p2370_p13 }
  0x35   : > { %p2091_p6 = pneg %p2090_p1 }
  0x37   : > { %p2096_p3 = pnand %p2094_p10, %p2091_p6 }
  0x39   : > { %2099 = shalt.err (!%p2096_p3)
}
  0x3a   : > { %s2100_s11 = scalar_lea.vmem %s2360_s14, 2048  ;;  %p2108_p12 = scmp.lt.s32.totalorder %s2360_s14, %s2360_s14 }
  0x3b   : > { %p2101_p5 = scmp.ne.s32.totalorder %s2360_s14, %s2100_s11  ;;  %p2109_p0 = scmp.lt.s32.totalorder %s2100_s11, %s2100_s11 }
  0x3d   : > { %p2103_p7 = pnand %p2101_p5, %p2370_p13  ;;  %p2110_p2 = por %p2109_p0, %p2108_p12 }
  0x3f   : > { %p2104_p9 = pneg %p2103_p7 }
  0x41   : > { %p2111_p1 = pnand %p2110_p2, %p2104_p9 }
  0x43   : > { %2114 = shalt.err (!%p2111_p1)
}
  0x44   : > { %s2253_s29 = smov 64   ;;  %s2254_s10 = smov 4  }
  0x45   : > { %1814 = dma.hbm_to_vmem [thread:$0]  (!%p2356_p11), %s2590_s3, 2048, %s2360_s14, [#allocation6], %s2253_s29, %s2253_s29, %s2254_s10  }
  0x46   : > { %s2255_s16 = smov [#allocation8]   ;;  %s2415_s18 = sadd.s32 1, %s2247_s27  }
  0x47   : > { %s252_s17 = sshll.u32 %s2255_s16, 4  ;;  %s2115_s22 = scalar_lea.hbm %s2592_s5, 1024  ;;  %s253_s17 = int_to_ptr.vmem [resolvable:$true] %s252_s17 }
  0x48   : > { %p2116_p6 = scmp.ne.s32.totalorder %s2592_s5, %s2115_s22  ;;  %p2122_p5 = scmp.lt.u32.totalorder %s2115_s22, %s2592_s5 }
  0x4a   : > { %p2118_p10 = pnand %p2116_p6, %p2370_p13 }
  0x4c   : > { %p2119_p3 = pneg %p2118_p10 }
  0x4e   : > { %p2124_p7 = pnand %p2122_p5, %p2119_p3 }
  0x50   : > { %2127 = shalt.err (!%p2124_p7)
}
  0x51   : > { %s2128_s14 = scalar_lea.vmem %s253_s17, 1024  ;;  %p2136_p2 = scmp.lt.s32.totalorder %s253_s17, %s253_s17 }
  0x52   : > { %p2129_p9 = scmp.ne.s32.totalorder %s253_s17, %s2128_s14  ;;  %p2137_p1 = scmp.lt.s32.totalorder %s2128_s14, %s2128_s14 }
  0x54   : > { %p2131_p12 = pnand %p2129_p9, %p2370_p13  ;;  %p2138_p4 = por %p2137_p1, %p2136_p2 }
  0x56   : > { %p2132_p0 = pneg %p2131_p12 }
  0x58   : > { %p2139_p8 = pnand %p2138_p4, %p2132_p0 }
  0x5a   : > { %2142 = shalt.err (!%p2139_p8)
}
  0x5b   : > { %1817 = dma.hbm_to_vmem [thread:$0]  (!%p2356_p11), %s2592_s5, 1024, %s253_s17, [#allocation9], %s2253_s29, %s2253_s29, %s2254_s10  }
  0x5c   : > { %s29_s1 = ssub.s32 %s2247_s27, %s2415_s18  ;;  %s32_s8 = sadd.s32 1, %s2243_s26 }
  0x5d   : > { %p30_p4 = scmp.eq.s32.totalorder %s29_s1, 0  ;;  %p39_p8 = scmp.ne.s32.totalorder %s2243_s26, %s2239_s25 }
  0x5e   : > { %p40_p13 = scmp.eq.s32.totalorder %s2247_s27, 0  ;;  %p1829_p6 = scmp.lt.s32.totalorder %s2247_s27, 2 }
  0x5f   : > { %s2443_s12 = scalar_select %p30_p4, %s2243_s26, %s32_s8  }
  0x60   : > { %p41_p10 = por %p40_p13, %p39_p8  ;;  %p2607_p3 = scmp.eq.s32.totalorder %s2326_s28, 1 }
  0x61   : > { %s269_s16 = sand.u32 1, %s2243_s26   ;;  %s1790_s19 = smul.u32 1792, %s2247_s27 }
  0x62   : > { %p2447_p5 = por %p2607_p3, %p39_p8  ;;  %s1789_s21 = smul.u32 112, %s269_s16 }
  0x63   : > { %s2456_s29 = scalar_lea.hbm %s2587_s0, %s1790_s19  ;;  %p2458_p11 = pnand %p1829_p6, %p41_p10 }
  0x64   : > { %s273_s17 = scalar_lea.vmem [#allocation2], %s1789_s21  ;;  %s2464_s14 = scalar_lea.sflag [#allocation3], %s269_s16 }
  0x65   : > { %s281_s11 = sshll.u32 %s273_s17, 4  ;;  %s2143_s13 = scalar_lea.hbm %s2456_s29, 1792  ;;  %s2462_s11 = int_to_ptr.vmem [resolvable:$true] %s281_s11 }
  0x66   : > { %p2144_p7 = scmp.ne.s32.totalorder %s2456_s29, %s2143_s13  ;;  %p2145_p9 = pneg %p2458_p11 }
  0x67   : > { %s2148_s8 = scalar_lea.hbm %s2587_s0, 3584  ;;  %p2149_p2 = scmp.lt.u32.totalorder %s2456_s29, %s2587_s0 }
  0x68   : > { %p2146_p12 = pnand %p2145_p9, %p2144_p7  ;;  %p2150_p1 = scmp.lt.u32.totalorder %s2148_s8, %s2143_s13 }
  0x69   : > { %p2152_p8 = scmp.lt.u32.totalorder %s2143_s13, %s2456_s29 }
  0x6a   : > { %p2147_p0 = pneg %p2146_p12  ;;  %p2151_p4 = por %p2150_p1, %p2149_p2 }
  0x6c   : > { %p2153_p13 = por %p2152_p8, %p2151_p4 }
  0x6e   : > { %p2154_p6 = pnand %p2153_p13, %p2147_p0 }
  0x70   : > { %2157 = shalt.err (!%p2154_p6)
}
  0x71   : > { %s2158_s16 = scalar_lea.vmem %s2462_s11, 1792  ;;  %s2256_s21 = smov [#allocation2]  }
  0x72   : > { %p2159_p10 = scmp.ne.s32.totalorder %s2462_s11, %s2158_s16  ;;  %s2163_s23 = sshll.u32 %s2256_s21, 4  ;;  %s2164_s23 = int_to_ptr.vmem [resolvable:$false] %s2163_s23 }
  0x73   : > { %s2165_s17 = scalar_lea.vmem %s2164_s23, 3584  ;;  %p2166_p12 = scmp.lt.s32.totalorder %s2462_s11, %s2164_s23 }
  0x74   : > { %p2161_p3 = pnand %p2159_p10, %p2145_p9  ;;  %p2167_p2 = scmp.lt.s32.totalorder %s2165_s17, %s2158_s16 }
  0x76   : > { %p2162_p7 = pneg %p2161_p3  ;;  %p2168_p1 = por %p2167_p2, %p2166_p12 }
  0x78   : > { %p2169_p4 = pnand %p2168_p1, %p2162_p7 }
  0x7a   : > { %2172 = shalt.err (!%p2169_p4)
}
  0x7b   : > { %s2257_s13 = smov 896   ;;  %s2258_s15 = smov 56  }
  0x7c   : > { %1821 = dma.hbm_to_vmem [thread:$0]  (!%p2458_p11), %s2456_s29, 1792, %s2462_s11, %s2464_s14, %s2257_s13, %s2257_s13, %s2258_s15  }
  0x7d   : > { %p2610_p9 = scmp.ne.s32.totalorder %s2603_s9, 0 }
  0x7e   : > { %s2495_s1 = sand.u32 (!%p2610_p9), 1, %s2239_s25   ;;  %p2611_p0 = scmp.ne.s32.totalorder (!%p2610_p9), %s2600_s30, 0 }
  0x7f   : > { %293 = sbr.rel (%p2610_p9) target bundleno = 1275 (0x4fb), region = 48  ;;  %s296_s19 = scalar_lea.sflag (!%p2610_p9), [#allocation3], %s2495_s1 }
  0x80   : > { %s1791_s8 = smul.u32 (!%p2610_p9), 112, %s2495_s1 }
  0x82   : > { %s2499_s22 = scalar_lea.vmem (!%p2610_p9), [#allocation2], %s1791_s8 }
  0x86   : > { %2218 = dma.done.wait (%p2611_p0), %s296_s19, 1792  }
  0x87   : > { %2220 = vsyncadd (%p2611_p0), %s296_s19, 4294965504  ;;  %p2612_p11 = scmp.eq.s32.totalorder %s2326_s28, 0 }
  0x89   : > { %2222 = dma.done.wait (%p2612_p11), [#allocation6], 14592   ;;  %p2613_p8 = pmov %p2612_p11 }
  0x8b   : > { %2224 = vsyncadd (%p2613_p8), [#allocation6], 4294952704  ;;  %p2614_p13 = pmov %p2613_p8 }
  0x8c   : > { %p2615_p6 = pmov %p2613_p8 }
  0x8d   : > { %2226 = dma.done.wait (%p2614_p13), [#allocation9], 1024  }
  0x8e   : > { %2228 = vsyncadd (%p2615_p6), [#allocation9], 4294966272  ;;  %v1880_v0 = vld [vmem:[#allocation5 + $0x104] ss:$8 sps:$4 sm:$0xff]   ;;  %v1882_v1 = vld [vmem:[#allocation5 + $0x100] ss:$8 sps:$4 sm:$0xff]  }
  0x8f   : > { %1013 = vmatprep.subr.bf16.mxu0 %v1880_v0  ;;  %v1883_v2 = vld [vmem:[#allocation5 + $0x114] ss:$8 sps:$4 sm:$0xff]   ;;  %v1885_v3 = vld [vmem:[#allocation5 + $0x110] ss:$8 sps:$4 sm:$0xff]   ;;  %v1886_v4 = vld [vmem:[#allocation5 + $0x124] ss:$8 sps:$4 sm:$0xff]  }
  0x90   : > { %1014 = vmatpush1.bf16.msra.mxu0 %v1882_v1  ;;  %v1888_v5 = vld [vmem:[#allocation5 + $0x120] ss:$8 sps:$4 sm:$0xff]   ;;  %v1889_v6 = vld [vmem:[#allocation5 + $0x134] ss:$8 sps:$4 sm:$0xff]   ;;  %v1891_v7 = vld [vmem:[#allocation5 + $0x130] ss:$8 sps:$4 sm:$0xff]  }
  0x91   : > { %1015 = vmatprep.subr.bf16.mxu0 %v1883_v2  ;;  %v1892_v8 = vld [vmem:[#allocation5 + $0x144] ss:$8 sps:$4 sm:$0xff]   ;;  %v1894_v9 = vld [vmem:[#allocation5 + $0x140] ss:$8 sps:$4 sm:$0xff]   ;;  %v1895_v10 = vld [vmem:[#allocation5 + $0x154] ss:$8 sps:$4 sm:$0xff]  }
  0x92   : > { %v1897_v11 = vld [vmem:[#allocation5 + $0x150] ss:$8 sps:$4 sm:$0xff]   ;;  %v1898_v12 = vld [vmem:[#allocation5 + $0x164] ss:$8 sps:$4 sm:$0xff]   ;;  %v1900_v16 = vld [vmem:[#allocation5 + $0x160] ss:$8 sps:$4 sm:$0xff]  }
  0x93   : > { %v348_v13 = vld [vmem:[%s2499_s22 + $0x18] sm:$0xff]  ;;  %v355_v14 = vld [vmem:[%s2499_s22 + $0x50] sm:$0xff]  ;;  %v354_v55 = vld [vmem:[%s2499_s22 + $0x48] sm:$0xff]  ;;  %vm966_vm0 = vcmask 130048   ;;  %vm2261_vm1 = vmmov 0   ;;  %s1590_s16 = sshll.u32 %s2495_s1, 4 }
  0x94   : > { %1016 = vmatpush1.bf16.msra.mxu0 %v1885_v3  ;;  %v362_v15 = vpack.c.bf16 %v355_v14, %v348_v13  ;;  %v1901_v17 = vld [vmem:[#allocation5 + $0x174] ss:$8 sps:$4 sm:$0xff]   ;;  %v1934_v18 = vld [vmem:[#allocation5 + $0x4] ss:$8 sps:$4 sm:$0xff]   ;;  %v1903_v19 = vld [vmem:[#allocation5 + $0x170] ss:$8 sps:$4 sm:$0xff]  }
  0x95   : > { %1017 = vmatprep.subr.bf16.mxu0 %v1886_v4  ;;  %v1904_v20 = vld [vmem:[#allocation5 + $0x184] ss:$8 sps:$4 sm:$0xff]   ;;  %v1939_v21 = vld [vmem:[#allocation5] ss:$8 sps:$4 sm:$0xff]   ;;  %970 = vmatprep.subr.bf16.mxu1 %v1934_v18  ;;  %v1940_v22 = vld [vmem:[#allocation5 + $0x14] ss:$8 sps:$4 sm:$0xff]  }
  0x96   : > { %1045 = vmatprep.mubr.bf16.mxu0 %v362_v15  ;;  %971 = vmatpush1.bf16.msra.mxu1 %v1939_v21  ;;  %v1906_v23 = vld [vmem:[#allocation5 + $0x180] ss:$8 sps:$4 sm:$0xff]   ;;  %v1945_v24 = vld [vmem:[#allocation5 + $0x10] ss:$8 sps:$4 sm:$0xff]   ;;  %v1946_v25 = vld [vmem:[#allocation5 + $0x24] ss:$8 sps:$4 sm:$0xff]  }
  0x97   : > { %972 = vmatprep.subr.bf16.mxu1 %v1940_v22  ;;  %v1907_v26 = vld [vmem:[#allocation5 + $0x194] ss:$8 sps:$4 sm:$0xff]   ;;  %v1951_v27 = vld [vmem:[#allocation5 + $0x20] ss:$8 sps:$4 sm:$0xff]   ;;  %v1909_v29 = vld [vmem:[#allocation5 + $0x190] ss:$8 sps:$4 sm:$0xff]  }
  0x98   : > { %1018 = vmatpush1.bf16.msra.mxu0 %v1888_v5  ;;  %v1952_v28 = vld [vmem:[#allocation5 + $0x34] ss:$8 sps:$4 sm:$0xff]   ;;  %v1910_v30 = vld [vmem:[#allocation5 + $0x1a4] ss:$8 sps:$4 sm:$0xff]   ;;  %v1957_v31 = vld [vmem:[#allocation5 + $0x30] ss:$8 sps:$4 sm:$0xff]  }
  0x99   : > { %1019 = vmatprep.subr.bf16.mxu0 %v1889_v6  ;;  %v1958_v32 = vld [vmem:[#allocation5 + $0x44] ss:$8 sps:$4 sm:$0xff]   ;;  %v1912_v33 = vld [vmem:[#allocation5 + $0x1a0] ss:$8 sps:$4 sm:$0xff]   ;;  %v1913_v34 = vld [vmem:[#allocation5 + $0x1b4] ss:$8 sps:$4 sm:$0xff]  }
  0x9a   : > { %973 = vmatpush1.bf16.msra.mxu1 %v1945_v24  ;;  %v1963_v35 = vld [vmem:[#allocation5 + $0x40] ss:$8 sps:$4 sm:$0xff]   ;;  %v1964_v36 = vld [vmem:[#allocation5 + $0x54] ss:$8 sps:$4 sm:$0xff]   ;;  %v1915_v37 = vld [vmem:[#allocation5 + $0x1b0] ss:$8 sps:$4 sm:$0xff]  }
  0x9b   : > { %974 = vmatprep.subr.bf16.mxu1 %v1946_v25  ;;  %v1916_v38 = vld [vmem:[#allocation5 + $0x1c4] ss:$8 sps:$4 sm:$0xff]   ;;  %v1969_v39 = vld [vmem:[#allocation5 + $0x50] ss:$8 sps:$4 sm:$0xff]   ;;  %v1918_v41 = vld [vmem:[#allocation5 + $0x1c0] ss:$8 sps:$4 sm:$0xff]  }
  0x9c   : > { %1020 = vmatpush1.bf16.msra.mxu0 %v1891_v7  ;;  %v1970_v40 = vld [vmem:[#allocation5 + $0x64] ss:$8 sps:$4 sm:$0xff]   ;;  %v1919_v42 = vld [vmem:[#allocation5 + $0x1d4] ss:$8 sps:$4 sm:$0xff]   ;;  %v1975_v43 = vld [vmem:[#allocation5 + $0x60] ss:$8 sps:$4 sm:$0xff]  }
  0x9d   : > { %1021 = vmatprep.subr.bf16.mxu0 %v1892_v8  ;;  %v1976_v44 = vld [vmem:[#allocation5 + $0x74] ss:$8 sps:$4 sm:$0xff]   ;;  %v1921_v45 = vld [vmem:[#allocation5 + $0x1d0] ss:$8 sps:$4 sm:$0xff]   ;;  %v1922_v46 = vld [vmem:[#allocation5 + $0x1e4] ss:$8 sps:$4 sm:$0xff]  }
  0x9e   : > { %975 = vmatpush1.bf16.msra.mxu1 %v1951_v27  ;;  %v1981_v47 = vld [vmem:[#allocation5 + $0x70] ss:$8 sps:$4 sm:$0xff]   ;;  %v1982_v48 = vld [vmem:[#allocation5 + $0x84] ss:$8 sps:$4 sm:$0xff]   ;;  %v1924_v49 = vld [vmem:[#allocation5 + $0x1e0] ss:$8 sps:$4 sm:$0xff]  }
  0x9f   : > { %976 = vmatprep.subr.bf16.mxu1 %v1952_v28  ;;  %v1925_v50 = vld [vmem:[#allocation5 + $0x1f4] ss:$8 sps:$4 sm:$0xff]   ;;  %v1987_v51 = vld [vmem:[#allocation5 + $0x80] ss:$8 sps:$4 sm:$0xff]   ;;  %v1927_v53 = vld [vmem:[#allocation5 + $0x1f0] ss:$8 sps:$4 sm:$0xff]  }
  0xa0   : > { %1022 = vmatpush1.bf16.msra.mxu0 %v1894_v9  ;;  %v1988_v52 = vld [vmem:[#allocation5 + $0x94] ss:$8 sps:$4 sm:$0xff]   ;;  %v1930_v56 = vld [vmem:[#allocation5 + $0x204] ss:$8 sps:$4 sm:$0xff]   ;;  %v1993_v57 = vld [vmem:[#allocation5 + $0x90] ss:$8 sps:$4 sm:$0xff]  }
  0xa1   : > { %1023 = vmatprep.subr.bf16.mxu0 %v1895_v10  ;;  %v347_v54 = vld [vmem:[%s2499_s22 + $0x10] sm:$0xff]  ;;  %v350_v61 = vld [vmem:[%s2499_s22 + $0x28] sm:$0xff]  ;;  %v357_v62 = vld [vmem:[%s2499_s22 + $0x60] sm:$0xff]  ;;  %s341_s21 = scalar_lea.vmem [#allocation10], %s1590_s16  ;;  %s1721_s17 = sshll.u32 %s2326_s28, 8 }
  0xa2   : > { %977 = vmatpush1.bf16.msra.mxu1 %v1957_v31  ;;  %v1928_v58 = vld [vmem:[#allocation5 + $0x200] ss:$8 sps:$4 sm:$0xff]   ;;  %v361_v59 = vpack.c.bf16 %v354_v55, %v347_v54  ;;  %v1994_v60 = vld [vmem:[#allocation5 + $0xa4] ss:$8 sps:$4 sm:$0xff]   ;;  %v1933_v63 = vld [vmem:[#allocation5 + $0x214] ss:$8 sps:$4 sm:$0xff]   ;;  %v364_v0 = vpack.c.bf16 %v357_v62, %v350_v61  ;;  %s2543_s8 = scalar_lea.hbm %s2594_s7, %s1721_s17 }
  0xa3   : > { %978 = vmatprep.subr.bf16.mxu1 %v1958_v32  ;;  %v1999_v1 = vld [vmem:[#allocation5 + $0xa0] ss:$8 sps:$4 sm:$0xff]   ;;  %v2000_v2 = vld [vmem:[#allocation5 + $0xb4] ss:$8 sps:$4 sm:$0xff]   ;;  %v1931_v3 = vld [vmem:[#allocation5 + $0x210] ss:$8 sps:$4 sm:$0xff]  }
  0xa4   : > { %1024 = vmatpush1.bf16.msra.mxu0 %v1897_v11  ;;  %v1938_v4 = vld [vmem:[#allocation5 + $0x224] ss:$8 sps:$4 sm:$0xff]   ;;  %v2005_v7 = vld [vmem:[#allocation5 + $0xb0] ss:$8 sps:$4 sm:$0xff]   ;;  %v1936_v10 = vld [vmem:[#allocation5 + $0x220] ss:$8 sps:$4 sm:$0xff]  }
  0xa5   : > { %1025 = vmatprep.subr.bf16.mxu0 %v1898_v12  ;;  %v346_v5 = vld [vmem:[%s2499_s22 + $0x8] sm:$0xff]  ;;  %v353_v6 = vld [vmem:[%s2499_s22 + $0x40] sm:$0xff]  ;;  %v2259_v61 = vmov 0   ;;  %v351_v62 = vld [vmem:[%s2499_s22 + $0x30] sm:$0xff]  ;;  %s1475_s23 = sshll.u32 %s341_s21, 4  ;;  %s1462_s19 = scalar_lea.sflag [#allocation4], %s2495_s1  ;;  %s2538_s23 = int_to_ptr.vmem [resolvable:$true] %s1475_s23 }
  0xa6   : > { %979 = vmatpush1.bf16.msra.mxu1 %v1963_v35  ;;  %v360_v8 = vpack.c.bf16 %v353_v6, %v346_v5  ;;  %v2006_v9 = vld [vmem:[#allocation5 + $0xc4] ss:$8 sps:$4 sm:$0xff]   ;;  %v1944_v11 = vld [vmem:[#allocation5 + $0x234] ss:$8 sps:$4 sm:$0xff]   ;;  %v2011_v12 = vld [vmem:[#allocation5 + $0xc0] ss:$8 sps:$4 sm:$0xff]  }
  0xa7   : > { %980 = vmatprep.subr.bf16.mxu1 %v1964_v36  ;;  %v2012_v13 = vld [vmem:[#allocation5 + $0xd4] ss:$8 sps:$4 sm:$0xff]   ;;  %v1942_v14 = vld [vmem:[#allocation5 + $0x230] ss:$8 sps:$4 sm:$0xff]   ;;  %v1950_v15 = vld [vmem:[#allocation5 + $0x244] ss:$8 sps:$4 sm:$0xff]  }
  0xa8   : > { %1026 = vmatpush1.bf16.msra.mxu0 %v1900_v16  ;;  %1002 = vmatprep.mubr.bf16.mxu1 %v360_v8  ;;  %v1948_v16 = vld [vmem:[#allocation5 + $0x240] ss:$8 sps:$4 sm:$0xff]   ;;  %v1956_v18 = vld [vmem:[#allocation5 + $0x254] ss:$8 sps:$4 sm:$0xff]   ;;  %v1954_v22 = vld [vmem:[#allocation5 + $0x250] ss:$8 sps:$4 sm:$0xff]  }
  0xa9   : > { %1027 = vmatprep.subr.bf16.mxu0 %v1901_v17  ;;  %v2017_v17 = vld [vmem:[#allocation5 + $0xd0] ss:$8 sps:$4 sm:$0xff]   ;;  %v2024_v21 = vld [vmem:[#allocation5 + $0xf4] ss:$8 sps:$4 sm:$0xff]   ;;  %v1960_v28 = vld [vmem:[#allocation5 + $0x260] ss:$8 sps:$4 sm:$0xff]  }
  0xaa   : > { %981 = vmatpush1.bf16.msra.mxu1 %v1969_v39  ;;  %v2026_v24 = vld [vmem:[#allocation5 + $0xf0] ss:$8 sps:$4 sm:$0xff]   ;;  %v2031_v36 = vld [vmem:[#allocation7 + $0x50] sm:$0xff]   ;;  %v2016_v54 = vld [vmem:[#allocation5 + $0x2f4] ss:$8 sps:$4 sm:$0xff]   ;;  %v2260_v8 = vmov 0.0  }
  0xab   : > { %982 = vmatprep.subr.bf16.mxu1 %v1970_v40  ;;  %v345_v25 = vld [vmem:[%s2499_s22] sm:$0xff]  ;;  %v2029_v32 = vld [vmem:[#allocation7 + $0x48] sm:$0xff]   ;;  %v2033_v40 = vld [vmem:[#allocation7 + $0x58] sm:$0xff]   ;;  %s2262_s28 = smov [#allocation10]  }
  0xac   : > { %1028 = vmatpush1.bf16.msra.mxu0 %v1903_v19  ;;  %v2018_v19 = vld [vmem:[#allocation5 + $0xe4] ss:$8 sps:$4 sm:$0xff]   ;;  %v2027_v27 = vld [vmem:[#allocation7 + $0x40] sm:$0xff]   ;;  %v2030_v35 = vld [vmem:[#allocation7 + $0x8] sm:$0xff]   ;;  %s2177_s30 = sshll.u32 %s2262_s28, 4  ;;  %s2178_s30 = int_to_ptr.vmem [resolvable:$false] %s2177_s30 }
  0xad   : > { %1029 = vmatprep.subr.bf16.mxu0 %v1904_v20  ;;  %v2023_v20 = vld [vmem:[#allocation5 + $0xe0] ss:$8 sps:$4 sm:$0xff]   ;;  %v2028_v31 = vld [vmem:[#allocation7] sm:$0xff]   ;;  %s2179_s9 = scalar_lea.vmem %s2178_s30, 512  ;;  %p2180_p12 = scmp.lt.s32.totalorder %s2538_s23, %s2178_s30 }
  0xae   : > { %983 = vmatpush1.bf16.msra.mxu1 %v1975_v43  ;;  %v2032_v39 = vld [vmem:[#allocation7 + $0x10] sm:$0xff]   ;;  %v2034_v43 = vld [vmem:[#allocation7 + $0x18] sm:$0xff]   ;;  %v2014_v55 = vld [vmem:[#allocation5 + $0x2f0] ss:$8 sps:$4 sm:$0xff]  }
  0xaf   : > { %984 = vmatprep.subr.bf16.mxu1 %v1976_v44  ;;  %v2035_v44 = vld [vmem:[#allocation7 + $0x60] sm:$0xff]   ;;  %v2040_v5 = vld [vmem:[#allocation7 + $0x30] sm:$0xff]   ;;  %v2041_v6 = vld [vmem:[#allocation7 + $0x78] sm:$0xff]  }
  0xb0   : > { %1030 = vmatpush1.bf16.msra.mxu0 %v1906_v23  ;;  %v1962_v23 = vld [vmem:[#allocation5 + $0x264] ss:$8 sps:$4 sm:$0xff]  }
  0xb1   : > { %1031 = vmatprep.subr.bf16.mxu0 %v1907_v26  ;;  %v352_v26 = vld [vmem:[%s2499_s22 + $0x38] sm:$0xff] }
  0xb2   : > { %985 = vmatpush1.bf16.msra.mxu1 %v1981_v47  ;;  %v1990_v47 = vld [vmem:[#allocation5 + $0x2b0] ss:$8 sps:$4 sm:$0xff]  }
  0xb3   : > { %986 = vmatprep.subr.bf16.mxu1 %v1982_v48  ;;  %v1998_v48 = vld [vmem:[#allocation5 + $0x2c4] ss:$8 sps:$4 sm:$0xff]  }
  0xb4   : > { %1032 = vmatpush1.bf16.msra.mxu0 %v1909_v29  ;;  %v1968_v29 = vld [vmem:[#allocation5 + $0x274] ss:$8 sps:$4 sm:$0xff]  }
  0xb5   : > { %1033 = vmatprep.subr.bf16.mxu0 %v1910_v30  ;;  %v359_v30 = vpack.c.bf16 %v352_v26, %v345_v25 }
  0xb6   : > { %987 = vmatpush1.bf16.msra.mxu1 %v1987_v51  ;;  %v2002_v51 = vld [vmem:[#allocation5 + $0x2d0] ss:$8 sps:$4 sm:$0xff]  }
  0xb7   : > { %988 = vmatprep.subr.bf16.mxu1 %v1988_v52  ;;  %v2010_v52 = vld [vmem:[#allocation5 + $0x2e4] ss:$8 sps:$4 sm:$0xff]  }
  0xb8   : > { %1034 = vmatpush1.bf16.msra.mxu0 %v1912_v33  ;;  %v1966_v33 = vld [vmem:[#allocation5 + $0x270] ss:$8 sps:$4 sm:$0xff]  }
  0xb9   : > { %1035 = vmatprep.subr.bf16.mxu0 %v1913_v34  ;;  %v1974_v34 = vld [vmem:[#allocation5 + $0x284] ss:$8 sps:$4 sm:$0xff]  }
  0xba   : > { %989 = vmatpush1.bf16.msra.mxu1 %v1993_v57  ;;  %v356_v57 = vld [vmem:[%s2499_s22 + $0x58] sm:$0xff] }
  0xbb   : > { %990 = vmatprep.subr.bf16.mxu1 %v1994_v60  ;;  %v2020_v60 = vld [vmem:[#allocation5 + $0x300] ss:$8 sps:$4 sm:$0xff]  }
  0xbc   : > { %1036 = vmatpush1.bf16.msra.mxu0 %v1915_v37  ;;  %v1972_v37 = vld [vmem:[#allocation5 + $0x280] ss:$8 sps:$4 sm:$0xff]  }
  0xbd   : > { %1037 = vmatprep.subr.bf16.mxu0 %v1916_v38  ;;  %v1980_v38 = vld [vmem:[#allocation5 + $0x294] ss:$8 sps:$4 sm:$0xff]  }
  0xbe   : > { %991 = vmatpush1.bf16.msra.mxu1 %v1999_v1  ;;  %v2036_v1 = vld [vmem:[#allocation7 + $0x20] sm:$0xff]  }
  0xbf   : > { %992 = vmatprep.subr.bf16.mxu1 %v2000_v2  ;;  %v2037_v2 = vld [vmem:[#allocation7 + $0x68] sm:$0xff]  }
  0xc0   : > { %1038 = vmatpush1.bf16.msra.mxu0 %v1918_v41  ;;  %v1978_v41 = vld [vmem:[#allocation5 + $0x290] ss:$8 sps:$4 sm:$0xff]  }
  0xc1   : > { %1039 = vmatprep.subr.bf16.mxu0 %v1919_v42  ;;  %v1986_v42 = vld [vmem:[#allocation5 + $0x2a4] ss:$8 sps:$4 sm:$0xff]  }
  0xc2   : > { %993 = vmatpush1.bf16.msra.mxu1 %v2005_v7  ;;  %v2042_v7 = vld [vmem:[#allocation7 + $0x38] sm:$0xff]  }
  0xc3   : > { %994 = vmatprep.subr.bf16.mxu1 %v2006_v9 }
  0xc4   : > { %1040 = vmatpush1.bf16.msra.mxu0 %v1921_v45  ;;  %v1984_v45 = vld [vmem:[#allocation5 + $0x2a0] ss:$8 sps:$4 sm:$0xff]  }
  0xc5   : > { %1041 = vmatprep.subr.bf16.mxu0 %v1922_v46  ;;  %v1992_v46 = vld [vmem:[#allocation5 + $0x2b4] ss:$8 sps:$4 sm:$0xff]  }
  0xc6   : > { %995 = vmatpush1.bf16.msra.mxu1 %v2011_v12 }
  0xc7   : > { %996 = vmatprep.subr.bf16.mxu1 %v2012_v13  ;;  %v466_v13 = vlaneseq }
  0xc8   : > { %1042 = vmatpush1.bf16.msra.mxu0 %v1924_v49  ;;  %v1996_v49 = vld [vmem:[#allocation5 + $0x2c0] ss:$8 sps:$4 sm:$0xff]  }
  0xc9   : > { %1043 = vmatprep.subr.bf16.mxu0 %v1925_v50  ;;  %v2004_v50 = vld [vmem:[#allocation5 + $0x2d4] ss:$8 sps:$4 sm:$0xff]  }
  0xca   : > { %997 = vmatpush1.bf16.msra.mxu1 %v2017_v17 }
  0xcb   : > { %998 = vmatprep.subr.bf16.mxu1 %v2018_v19 }
  0xcc   : > { %1044 = vmatpush1.bf16.msra.mxu0 %v1927_v53  ;;  %v2008_v53 = vld [vmem:[#allocation5 + $0x2e0] ss:$8 sps:$4 sm:$0xff]  }
  0xcd   : > { %1056 = vmatprep.subr.bf16.mxu0 %v1930_v56  ;;  %v349_v56 = vld [vmem:[%s2499_s22 + $0x20] sm:$0xff] }
  0xce   : > { %999 = vmatpush1.bf16.msra.mxu1 %v2023_v20 }
  0xcf   : > { %1046 = vmatmul.mubr.bf16.vlgmr.msra.gmra.mrb[0].mxu0 %v361_v59  ;;  %1000 = vmatprep.subr.bf16.mxu1 %v2024_v21  ;;  %v363_v59 = vpack.c.bf16 %v356_v57, %v349_v56 }
  0xd0   : > { %1057 = vmatpush1.bf16.msra.mxu0 %v1928_v58  ;;  %1088 = vmatprep.mubr.bf16.mxu0 %v364_v0  ;;  %v2022_v58 = vld [vmem:[#allocation5 + $0x304] ss:$8 sps:$4 sm:$0xff]  }
  0xd1   : > { %1058 = vmatprep.subr.bf16.mxu0 %v1933_v63  ;;  %v358_v63 = vld [vmem:[%s2499_s22 + $0x68] sm:$0xff]  ;;  %s2173_s22 = scalar_lea.vmem %s2538_s23, 256 }
  0xd2   : > { %1001 = vmatpush1.bf16.msra.mxu1 %v2026_v24  ;;  %v365_v0 = vpack.c.bf16 %v358_v63, %v351_v62  ;;  %p2174_p10 = scmp.ne.s32.totalorder %s2538_s23, %s2173_s22  ;;  %p2181_p2 = scmp.lt.s32.totalorder %s2179_s9, %s2173_s22 }
  0xd3   : > { %1722 = vmatprep.subr.bf16.mxu1 %v2027_v27 }
  0xd4   : > { %1059 = vmatpush1.bf16.msra.mxu0 %v1931_v3  ;;  %v2038_v3 = vld [vmem:[#allocation7 + $0x28] sm:$0xff]   ;;  %p2175_p3 = pnand %p2174_p10, %p2447_p5  ;;  %p2182_p1 = por %p2181_p2, %p2180_p12 }
  0xd5   : > { %1060 = vmatprep.subr.bf16.mxu0 %v1938_v4  ;;  %1003 = vmatmul.mubr.bf16.vlgmr.msra.gmra.mrb[0].mxu1 %v359_v30  ;;  %v2039_v4 = vld [vmem:[#allocation7 + $0x70] sm:$0xff]  }
  0xd6   : > { %1723 = vmatpush3.bf16.msra.mxu1 %v2028_v31  ;;  %p2176_p7 = pneg %p2175_p3 }
  0xd7   : > { %1724 = vmatprep.subr.bf16.mxu1 %v2029_v32 }
  0xd8   : > { %1061 = vmatpush1.bf16.msra.mxu0 %v1936_v10  ;;  %p2183_p4 = pnand %p2182_p1, %p2176_p7 }
  0xd9   : > { %1062 = vmatprep.subr.bf16.mxu0 %v1944_v11 }
  0xda   : > { %1725 = vmatpush3.bf16.msra.mxu1 %v2030_v35 }
  0xdb   : > { %1726 = vmatprep.subr.bf16.mxu1 %v2031_v36 }
  0xdc   : > { %1063 = vmatpush1.bf16.msra.mxu0 %v1942_v14  ;;  %v467_v14 = vshrl.u32 %v466_v13, 7 }
  0xdd   : > { %1064 = vmatprep.subr.bf16.mxu0 %v1950_v15 }
  0xde   : > { %1727 = vmatpush3.bf16.msra.mxu1 %v2032_v39  ;;  %v468_v15 = vsub.s32 0, %v467_v14  ;;  %v472_v17 = vsub.s32 1, %v467_v14  ;;  %v2044_v39 = vld [vmem:[#allocation8 + $0x8] sm:$0xff]  }
  0xdf   : > { %1728 = vmatprep.subr.bf16.mxu1 %v2033_v40  ;;  %v2045_v40 = vld [vmem:[#allocation8 + $0x10] sm:$0xff]  }
  0xe0   : > { %1065 = vmatpush1.bf16.msra.mxu0 %v1948_v16  ;;  %v464_v16 = vld [vmem:[%s2589_s2] sm:$0x3] }
  0xe1   : > { %1066 = vmatprep.subr.bf16.mxu0 %v1956_v18  ;;  %v469_v18 = vrot.slane %v464_v16, %v468_v15  ;;  %v473_v19 = vrot.slane %v464_v16, %v472_v17 }
  0xe2   : > { %1729 = vmatpush3.bf16.msra.mxu1 %v2034_v43  ;;  %v2048_v43 = vld [vmem:[#allocation8 + $0x28] sm:$0xff]  }
  0xe3   : > { %1730 = vmatprep.subr.bf16.mxu1 %v2035_v44  ;;  %v2049_v44 = vld [vmem:[#allocation8 + $0x30] sm:$0xff]  }
  0xe4   : > { %1067 = vmatpush1.bf16.msra.mxu0 %v1954_v22 }
  0xe5   : > { %1068 = vmatprep.subr.bf16.mxu0 %v1962_v23 }
  0xe6   : > { %1731 = vmatpush3.bf16.msra.mxu1 %v2036_v1 }
  0xe7   : > { %1732 = vmatprep.subr.bf16.mxu1 %v2037_v2 }
  0xe8   : > { %1069 = vmatpush1.bf16.msra.mxu0 %v1960_v28 }
  0xe9   : > { %1070 = vmatprep.subr.bf16.mxu0 %v1968_v29 }
  0xea   : > { %1733 = vmatpush3.bf16.msra.mxu1 %v2038_v3 }
  0xeb   : > { %1734 = vmatprep.subr.bf16.mxu1 %v2039_v4 }
  0xec   : > { %1071 = vmatpush1.bf16.msra.mxu0 %v1966_v33 }
  0xed   : > { %1072 = vmatprep.subr.bf16.mxu0 %v1974_v34 }
  0xee   : > { %1735 = vmatpush3.bf16.msra.mxu1 %v2040_v5 }
  0xef   : > { %1736 = vmatprep.subr.bf16.mxu1 %v2041_v6 }
  0xf0   : > { %1073 = vmatpush1.bf16.msra.mxu0 %v1972_v37 }
  0xf1   : > { %1074 = vmatprep.subr.bf16.mxu0 %v1980_v38  ;;  %v2043_v38 = vld [vmem:[#allocation8] sm:$0xff]  }
  0xf2   : > { %1737 = vmatpush3.bf16.msra.mxu1 %v2042_v7 }
  0xf3   : > { %1753 = vmatprep.subr.bf16.mxu1 %v2260_v8 }
  0xf4   : > { %1075 = vmatpush1.bf16.msra.mxu0 %v1978_v41  ;;  %v2046_v41 = vld [vmem:[#allocation8 + $0x18] sm:$0xff]  }
  0xf5   : > { %1076 = vmatprep.subr.bf16.mxu0 %v1986_v42  ;;  %v2047_v42 = vld [vmem:[#allocation8 + $0x20] sm:$0xff]  }
  0xf8   : > { %1077 = vmatpush1.bf16.msra.mxu0 %v1984_v45  ;;  %v2050_v45 = vld [vmem:[#allocation8 + $0x38] sm:$0xff]  }
  0xf9   : > { %1078 = vmatprep.subr.bf16.mxu0 %v1992_v46 }
  0xfc   : > { %1079 = vmatpush1.bf16.msra.mxu0 %v1990_v47  ;;  %v1690_v47 = vld [vmem:[%s2591_s4] ss:$0 sm:$0xff] }
  0xfd   : > { %1080 = vmatprep.subr.bf16.mxu0 %v1998_v48 }
 0x100   : > { %1081 = vmatpush1.bf16.msra.mxu0 %v1996_v49 }
 0x101   : > { %1082 = vmatprep.subr.bf16.mxu0 %v2004_v50 }
 0x104   : > { %1083 = vmatpush1.bf16.msra.mxu0 %v2002_v51 }
 0x105   : > { %1084 = vmatprep.subr.bf16.mxu0 %v2010_v52 }
 0x108   : > { %1085 = vmatpush1.bf16.msra.mxu0 %v2008_v53 }
 0x109   : > { %1086 = vmatprep.subr.bf16.mxu0 %v2016_v54 }
 0x10c   : > { %1087 = vmatpush1.bf16.msra.mxu0 %v2014_v55 }
 0x10d   : > { %1099 = vmatprep.subr.bf16.mxu0 %v2022_v58  ;;  %v1707_v58 = vld [vmem:[%s2593_s6] ss:$0 sm:$0xff] }
 0x10f   : > { %1089 = vmatmul.mubr.bf16.vlgmr.msra.gmra.mrb[0].mxu0 %v363_v59 }
 0x110   : > { %1100 = vmatpush1.bf16.msra.mxu0 %v2020_v60  ;;  %1131 = vmatprep.mubr.bf16.mxu0 %v2259_v61 }
 0x11b   : > { %1689 = vmatmul.mubr.msk.bf16.vlgmr.msra.gmra.mrb[0].mxu0 %vm966_vm0, %v365_v0 }
 0x1a8   : > { %v1004_v9 = vpop.f32.mrb[0].mxu1 }
 0x1a9   : > { %v1006_v10 = vpop.f32.mrb[1].mxu1  ;;  %v1005_v20 = vadd.f32 %v1004_v9, %v469_v18 }
 0x1aa   : > { %v1008_v11 = vpop.f32.mrb[2].mxu1  ;;  %v1007_v21 = vadd.f32 %v1006_v10, %v473_v19 }
 0x1ab   : > { %v1010_v12 = vpop.f32.mrb[3].mxu1  ;;  %v1009_v23 = vadd.f32 %v1008_v11, %v469_v18 }
 0x1ac   : > { %v1011_v26 = vadd.f32 %v1010_v12, %v473_v19 }
 0x1ee   : > { %v1133_v22 = vpop.f32.mrb[0].mxu0 }
 0x1ef   : > { %v1774_v24 = vadd.f32 %v1133_v22, %v1005_v20  ;;  %v1135_v25 = vpop.f32.mrb[1].mxu0 }
 0x1f0   : > { %v1776_v27 = vadd.f32 %v1135_v25, %v1007_v21  ;;  %v1137_v28 = vpop.f32.mrb[2].mxu0 }
 0x1f1   : > { %v1778_v29 = vadd.f32 %v1137_v28, %v1009_v23  ;;  %v1139_v30 = vpop.f32.mrb[3].mxu0  ;;  %v1142_v32 = vmax.f32 %v1774_v24, 0.0 }
 0x1f2   : > { %v1780_v31 = vadd.f32 %v1139_v30, %v1011_v26  ;;  %v1143_v34 = vmax.f32 %v1776_v27, 0.0 }
 0x1f3   : > { %v1144_v33 = vmax.f32 %v1778_v29, 0.0 }
 0x1f4   : > { %v1145_v35 = vmax.f32 %v1780_v31, 0.0 }
 0x1f5   : > { %v1146_v36 = vpack.c.bf16 %v1144_v33, %v1142_v32 }
 0x1f6   : > { %v1147_v37 = vpack.c.bf16 %v1145_v35, %v1143_v34 }
 0x1f8   : > { %1315 = vmatprep.mubr.bf16.mxu1 %v1147_v37 }
 0x1f9   : > { %1316 = vmatmul.mubr.bf16.vlgmr.msra.gmra.mrb[4].mxu1 %v1146_v36 }
 0x1fa   : > { %1754 = vmatpush3.bf16.msra.mxu1 %v2043_v38  ;;  %1769 = vmatprep.mubr.msk.bf16.mxu1 %vm2261_vm1, %v2260_v8 }
 0x1fb   : > { %1755 = vmatprep.subr.bf16.mxu1 %v2260_v8 }
 0x1fe   : > { %1756 = vmatpush3.bf16.msra.mxu1 %v2044_v39 }
 0x1ff   : > { %1757 = vmatprep.subr.bf16.mxu1 %v2260_v8 }
 0x202   : > { %1758 = vmatpush3.bf16.msra.mxu1 %v2045_v40 }
 0x203   : > { %1759 = vmatprep.subr.bf16.mxu1 %v2260_v8 }
 0x206   : > { %1760 = vmatpush3.bf16.msra.mxu1 %v2046_v41 }
 0x207   : > { %1761 = vmatprep.subr.bf16.mxu1 %v2260_v8 }
 0x20a   : > { %1762 = vmatpush3.bf16.msra.mxu1 %v2047_v42 }
 0x20b   : > { %1763 = vmatprep.subr.bf16.mxu1 %v2260_v8 }
 0x20e   : > { %1764 = vmatpush3.bf16.msra.mxu1 %v2048_v43 }
 0x20f   : > { %1765 = vmatprep.subr.bf16.mxu1 %v2260_v8 }
 0x212   : > { %1766 = vmatpush3.bf16.msra.mxu1 %v2049_v44 }
 0x213   : > { %1767 = vmatprep.subr.bf16.mxu1 %v2260_v8 }
 0x216   : > { %1768 = vmatpush3.bf16.msra.mxu1 %v2050_v45 }
 0x2cc   : > { %v1738_v46 = vpop.f32.mrb[4].mxu1 }
 0x2cd   : > { %v1739_v48 = vpop.f32.mrb[5].mxu1 }
 0x2ce   : > { %v1740_v49 = vadd.f32 %v1739_v48, %v1738_v46  ;;  %v1741_v50 = vpop.f32.mrb[6].mxu1 }
 0x2cf   : > { %v1742_v51 = vpop.f32.mrb[7].mxu1 }
 0x2d0   : > { %v1318_v52 = vadd.f32 %v1740_v49, %v1690_v47  ;;  %v1743_v53 = vadd.f32 %v1742_v51, %v1741_v50 }
 0x2d2   : > { %v1321_v54 = vadd.f32 %v1743_v53, %v1690_v47  ;;  %v1324_v55 = vmax.f32 %v1318_v52, 0.0 }
 0x2d4   : > { %v1325_v56 = vmax.f32 %v1321_v54, 0.0 }
 0x2d6   : > { %v1326_v57 = vpack.c.bf16 %v1325_v56, %v1324_v55 }
 0x2d8   : > { %1770 = vmatmul.mubr.bf16.vlgmr.msra.gmra.mrb[8].mxu1 %v1326_v57 }
 0x3ab   : > { %v1432_v59 = vpop.f32.mrb[8].mxu1 }
 0x3ac   : > { %v1433_v60 = vadd.f32 %v1707_v58, %v1432_v59  ;;  %v1771_v61 = vpop.f32.mrb[9].mxu1 }
 0x3ad   : > { %v1435_v62 = vpop.f32.mrb[10].mxu1 }
 0x3ae   : > { %1439 = vmax.xlane.f32.xlu0 %v1433_v60  ;;  %v1772_v63 = vpop.f32.mrb[11].mxu1  ;;  %v1436_v0 = vadd.f32 %v1707_v58, %v1435_v62 }
 0x3b2   : > { %1441 = vmax.xlane.f32.xlu0 %v1436_v0 }
 0x43b   : > { %v1440_v1 = vpop.xlane.xlu0 %1439 }
 0x43c   : > { %v1443_v2 = vsub.f32 %v1433_v60, %v1440_v1 }
 0x43e   : > { %v1445_v3 = vmul.f32 1.442695, %v1443_v2 }
 0x43f   : > { %v1442_v4 = vpop.xlane.xlu0 %1441 }
 0x440   : > { %v1444_v5 = vsub.f32 %v1436_v0, %v1442_v4  ;;  %2051 = vpow2.f32 %v1445_v3 }
 0x442   : > { %v1447_v6 = vmul.f32 1.442695, %v1444_v5 }
 0x444   : > { %2053 = vpow2.f32 %v1447_v6 }
 0x44a   : > { %v2052_v7 = vpop.eup %2051 }
 0x44b   : > { %1449 = vadd.xlane.f32.xlu1 %v2052_v7 }
 0x44e   : > { %v2054_v8 = vpop.eup %2053 }
 0x44f   : > { %1451 = vadd.xlane.f32.xlu1 %v2054_v8 }
 0x4d8   : > { %v1450_v9 = vpop.xlane.xlu1 %1449 }
 0x4d9   : > { %2055 = vlog2.f32 %v1450_v9 }
 0x4dc   : > { %v1452_v10 = vpop.xlane.xlu1 %1451 }
 0x4dd   : > { %2057 = vlog2.f32 %v1452_v10 }
 0x4e3   : > { %v2056_v11 = vpop.eup %2055 }
 0x4e4   : > { %v1454_v12 = vmul.f32 0.6931472, %v2056_v11 }
 0x4e6   : > { %v1457_v13 = vsub.f32 %v1443_v2, %v1454_v12 }
 0x4e7   : > { %v2058_v14 = vpop.eup %2057 }
 0x4e8   : > { %1459 = vst [vmem:[%s341_s21] sm:$0xff] %v1457_v13  ;;  %v1456_v15 = vmul.f32 0.6931472, %v2058_v14 }
 0x4ea   : > { %v1458_v16 = vsub.f32 %v1444_v5, %v1456_v15 }
 0x4ec   : > { %1460 = vst [vmem:[%s341_s21 + $0x8] sm:$0xff] %v1458_v16 }
 0x4ed   : > { %2186 = shalt.err (!%p2183_p4)
}
 0x4ee   : > { %s2187_s29 = scalar_lea.hbm %s2543_s8, 256  ;;  %s2191_s14 = scalar_lea.hbm %s2594_s7, 512 }
 0x4ef   : > { %p2188_p9 = scmp.ne.s32.totalorder %s2543_s8, %s2187_s29  ;;  %p2192_p8 = scmp.lt.u32.totalorder %s2543_s8, %s2594_s7 }
 0x4f0   : > { %p2193_p13 = scmp.lt.u32.totalorder %s2191_s14, %s2187_s29  ;;  %p2195_p10 = scmp.lt.u32.totalorder %s2187_s29, %s2543_s8 }
 0x4f1   : > { %p2189_p0 = pnand %p2188_p9, %p2447_p5 }
 0x4f2   : > { %p2194_p6 = por %p2193_p13, %p2192_p8 }
 0x4f3   : > { %p2190_p11 = pneg %p2189_p0 }
 0x4f4   : > { %p2196_p3 = por %p2195_p10, %p2194_p6 }
 0x4f6   : > { %p2197_p7 = pnand %p2196_p3, %p2190_p11 }
 0x4f8   : > { %2200 = shalt.err (!%p2197_p7)
}
 0x4f9   : > { %s2263_s17 = smov 128   ;;  %s2264_s13 = smov 8  }
 0x4fa   : > { %1806 = dma.vmem_to_hbm [thread:$0]  (%p2447_p5), %s2538_s23, 256, %s2543_s8, %s1462_s19, %s2263_s17, %s2263_s17, %s2264_s13  }
 0x4fb PF: > { %s2616_s15 = sld [smem:[#allocation15_spill]]  ;;  %s1490_s22 = sand.u32 1, %s2235_s24  }
 0x4fc   : > { %p2618_p2 = scmp.ge.s32.totalorder %s2247_s27, 2  ;;  %s1491_s28 = scalar_lea.sflag [#allocation4], %s1490_s22 }
 0x501   : > { %p2617_p12 = scmp.ne.s32.totalorder %s2616_s15, 0 }
 0x503   : > { %p1823_p1 = pnand %p2618_p2, %p2617_p12 }
 0x505   : > { %2230 = dma.done.wait (!%p1823_p1), %s1491_s28, 256  }
 0x506   : > { %2232 = vsyncadd (!%p1823_p1), %s1491_s28, 4294967040  ;;  %p22_p4 = scmp.ge.s32.totalorder %s2415_s18, 4   ;;  %s2619_s24 = smov %s2239_s25 }
 0x507   : > { %s2620_s25 = smov %s2243_s26  ;;  %s2621_s26 = smov %s2443_s12 }
 0x508   : > { %s2622_s27 = smov %s2415_s18  ;;  %24 = sbr.rel (!%p22_p4) target bundleno = 9 (0x9), region = 105 }
 0x50f   :  { %1496 = vsyncpa [#allocation3], 1 }
 0x510   :  { %1498 = vsyncpa [#allocation3 + $0x1], 1 }
 0x511   :  { %1499 = vsyncpa [#allocation6], 1 }
 0x512   :  { %1500 = vsyncpa [#allocation9], 1 }
 0x513   :  { %1501 = vsyncpa [#allocation4], 1 }
 0x514   :  { %1503 = vsyncpa [#allocation4 + $0x1], 1 }

</bundles_post_ra>
